<compile_context>
chip_gen: v7x
topology: tpu7x:2x2x1
jax: 0.10.0
libtpu: 0.0.40
codegen_flags: <defaults>
</compile_context>

<pallas_src>
import jax
import jax.numpy as jnp
import numpy as np
from jax.experimental import pallas as pl
from jax.experimental.pallas import tpu as pltpu

C1 = 16    # conv1 out channels
C2 = 32    # conv2 out channels
H = 128    # fc1 hidden size
K = 3      # conv kernel size (stride=1, padding=1)


def _cnn_kernel(xp_ref, w1_ref, b1_ref, w2bd_ref, b2t_ref,
                wf1_ref, bf1_ref, wf2_ref, bf2_ref,
                out_ref, im2col_ref):
    B = xp_ref.shape[0]
    Lp = xp_ref.shape[1]          # L + 2 (already padded)
    L = Lp - 2

    xp = xp_ref[...]              # (B, L+2)  batch on sublanes, length on lanes
    w1 = w1_ref[...]              # (K, C1)   w1[k, c] = torch_w1[c, 0, k]
    b1 = b1_ref[...]              # (1, C1)

    # ---- conv1 + ReLU on the VPU: one (B, C1) row per output position ----
    zero_row = jnp.zeros((B, C1), jnp.float32)
    rows = [zero_row]                                  # padded position p = 0
    for i in range(L):                                 # static, L = 6
        acc = b1
        for k in range(K):
            acc = acc + xp[:, i + k:i + k + 1] * w1[k:k + 1, :]   # (B,1)*(1,C1)
        rows.append(jnp.maximum(acc, 0.0))             # (B, C1)
    rows.append(zero_row)                              # padded position p = L+1

    # ---- im2col staging: column (l*K + k)*C1 + c  =  h1_padded[b, l+k, c] ----
    for l in range(L):
        for k in range(K):
            off = (l * K + k) * C1
            im2col_ref[:, off:off + C1] = rows[l + k]
    lhs = im2col_ref[...]                              # (B, L*K*C1)

    # ---- conv2 + ReLU: single matmul vs. block-diagonal weight ----
    h2 = jnp.dot(lhs, w2bd_ref[...], preferred_element_type=jnp.float32)
    h2 = jnp.maximum(h2 + b2t_ref[...], 0.0)           # (B, L*C2)

    # ---- fc1 + ReLU: single batched matmul ----
    h3 = jnp.dot(h2, wf1_ref[...], preferred_element_type=jnp.float32)
    h3 = jnp.maximum(h3 + bf1_ref[...], 0.0)           # (B, H)

    # ---- fc2: single batched matmul, single output store ----
    y = jnp.dot(h3, wf2_ref[...], preferred_element_type=jnp.float32)
    out_ref[...] = y + bf2_ref[...]                    # (B, 1)


@jax.jit
def cnn_forward(x, params):
    """x: (B, 1, L) float32, NCL like the PyTorch module."""
    w1, b1, w2, b2, wf1, bf1, wf2, bf2 = params
    B, cin, L = x.shape
    assert cin == 1

    # ---- wrapper-side layout plumbing (no compute hoisted from the kernel) ----
    xp = jnp.pad(x[:, 0, :], ((0, 0), (1, 1))).astype(jnp.float32)   # (B, L+2)
    w1r = jnp.transpose(w1[:, 0, :], (1, 0))                         # (K, C1)
    b1r = b1.reshape(1, C1)
    # conv2 weight in row order k*C1 + c, then block-diagonal over positions l.
    w2k = jnp.transpose(w2, (2, 1, 0)).reshape(K * C1, C2)           # (K*C1, C2)
    w2bd = jnp.kron(jnp.eye(L, dtype=jnp.float32), w2k)              # (L*K*C1, L*C2)
    b2t = jnp.tile(b2, L).reshape(1, L * C2)
    # PyTorch flattens (C2, L) as c*L + l -> permute to the kernel's l*C2 + c order.
    wf1r = jnp.transpose(wf1.reshape(H, C2, L), (2, 1, 0)).reshape(L * C2, H)
    bf1r = bf1.reshape(1, H)
    wf2r = wf2.T                                                     # (H, 1)
    bf2r = bf2.reshape(1, 1)

    out = pl.pallas_call(
        _cnn_kernel,
        out_shape=jax.ShapeDtypeStruct((B, 1), jnp.float32),
        in_specs=[pl.BlockSpec(memory_space=pltpu.MemorySpace.VMEM)] * 9,
        out_specs=pl.BlockSpec(memory_space=pltpu.MemorySpace.VMEM),
        scratch_shapes=[pltpu.VMEM((B, L * K * C1), jnp.float32)],
    )(xp, w1r, b1r, w2bd, b2t, wf1r, bf1r, wf2r, bf2r)

    return jnp.squeeze(out)   # matches `x.squeeze()` in the torch forward


def init_params(key, num_features=6):
    """Deterministic init matching PyTorch default shapes (uniform +-1/sqrt(fan_in))."""
    ks = jax.random.split(key, 8)

    def u(k, shape, fan_in):
        bound = 1.0 / float(np.sqrt(fan_in))
        return jax.random.uniform(k, shape, jnp.float32, -bound, bound)

    flat = C2 * num_features
    w1 = u(ks[0], (C1, 1, K), 1 * K)
    b1 = u(ks[1], (C1,), 1 * K)
    w2 = u(ks[2], (C2, C1, K), C1 * K)
    b2 = u(ks[3], (C2,), C1 * K)
    wf1 = u(ks[4], (H, flat), flat)
    bf1 = u(ks[5], (H,), flat)
    wf2 = u(ks[6], (1, H), H)
    bf2 = u(ks[7], (1,), H)
    return (w1, b1, w2, b2, wf1, bf1, wf2, bf2)


def cnn_reference(x, params):
    """Pure-JAX reference reproducing the PyTorch forward exactly."""
    w1, b1, w2, b2, wf1, bf1, wf2, bf2 = params
    B, _, L = x.shape
    xpad = jnp.pad(x, ((0, 0), (0, 0), (1, 1)))
    h1 = sum(jnp.einsum('bcl,oc->bol', xpad[:, :, k:k + L], w1[:, :, k])
             for k in range(K)) + b1[None, :, None]
    h1 = jnp.maximum(h1, 0.0)
    h1p = jnp.pad(h1, ((0, 0), (0, 0), (1, 1)))
    h2 = sum(jnp.einsum('bcl,oc->bol', h1p[:, :, k:k + L], w2[:, :, k])
             for k in range(K)) + b2[None, :, None]
    h2 = jnp.maximum(h2, 0.0)
    flat = h2.reshape(B, -1)
    h3 = jnp.maximum(flat @ wf1.T + bf1, 0.0)
    y = h3 @ wf2.T + bf2
    return jnp.squeeze(y)


if __name__ == "__main__":
    num_features = 6      # -> flattened_size = 32 * 6 = 192
    batch = 4
    key = jax.random.PRNGKey(0)
    k_param, k_x = jax.random.split(key)

    params = init_params(k_param, num_features)
    x = jax.random.normal(k_x, (batch, 1, num_features), jnp.float32)

    out = cnn_forward(x, params)
    out = jax.block_until_ready(out)

    ref = jax.block_until_ready(cnn_reference(x, params))
    assert out.shape == ref.shape == (batch,)
    np.testing.assert_allclose(np.asarray(out), np.asarray(ref),
                               rtol=1e-4, atol=1e-4)
    print("KERNEL_OK")
</pallas_src>

<mosaic_0001>
module attributes {stable_mosaic.version = 11 : i64} {
  func.func @_cnn_kernel(%arg0: memref<4x8xf32, #tpu.memory_space<vmem>>, %arg1: memref<3x16xf32, #tpu.memory_space<vmem>>, %arg2: memref<1x16xf32, #tpu.memory_space<vmem>>, %arg3: memref<288x192xf32, #tpu.memory_space<vmem>>, %arg4: memref<1x192xf32, #tpu.memory_space<vmem>>, %arg5: memref<192x128xf32, #tpu.memory_space<vmem>>, %arg6: memref<1x128xf32, #tpu.memory_space<vmem>>, %arg7: memref<128x1xf32, #tpu.memory_space<vmem>>, %arg8: memref<1x1xf32, #tpu.memory_space<vmem>>, %arg9: memref<4x1xf32, #tpu.memory_space<vmem>>, %arg10: memref<4x288xf32, #tpu.memory_space<vmem>>) attributes {dimension_semantics = [], scalar_prefetch = 0 : i64, scratch_operands = 1 : i64, tpu.core_type = #tpu.core_type<tc>} {
    %c0 = arith.constant 0 : index
    %c0_0 = arith.constant 0 : index
    %0 = vector.load %arg0[%c0, %c0_0] : memref<4x8xf32, #tpu.memory_space<vmem>>, vector<4x8xf32>
    %c0_1 = arith.constant 0 : index
    %c0_2 = arith.constant 0 : index
    %1 = vector.load %arg1[%c0_1, %c0_2] : memref<3x16xf32, #tpu.memory_space<vmem>>, vector<3x16xf32>
    %c0_3 = arith.constant 0 : index
    %c0_4 = arith.constant 0 : index
    %2 = vector.load %arg2[%c0_3, %c0_4] : memref<1x16xf32, #tpu.memory_space<vmem>>, vector<1x16xf32>
    %cst = arith.constant 0.000000e+00 : f32
    %3 = vector.broadcast %cst : f32 to vector<4x16xf32>
    %4 = vector.extract_strided_slice %0 {offsets = [0, 0], sizes = [4, 1], strides = [1, 1]} : vector<4x8xf32> to vector<4x1xf32>
    %5 = vector.extract_strided_slice %1 {offsets = [0, 0], sizes = [1, 16], strides = [1, 1]} : vector<3x16xf32> to vector<1x16xf32>
    %6 = vector.broadcast %4 : vector<4x1xf32> to vector<4x16xf32>
    %7 = vector.broadcast %5 : vector<1x16xf32> to vector<4x16xf32>
    %8 = arith.mulf %6, %7 : vector<4x16xf32>
    %9 = vector.broadcast %2 : vector<1x16xf32> to vector<4x16xf32>
    %10 = arith.addf %9, %8 : vector<4x16xf32>
    %11 = vector.extract_strided_slice %0 {offsets = [0, 1], sizes = [4, 1], strides = [1, 1]} : vector<4x8xf32> to vector<4x1xf32>
    %12 = vector.extract_strided_slice %1 {offsets = [1, 0], sizes = [1, 16], strides = [1, 1]} : vector<3x16xf32> to vector<1x16xf32>
    %13 = vector.broadcast %11 : vector<4x1xf32> to vector<4x16xf32>
    %14 = vector.broadcast %12 : vector<1x16xf32> to vector<4x16xf32>
    %15 = arith.mulf %13, %14 : vector<4x16xf32>
    %16 = arith.addf %10, %15 : vector<4x16xf32>
    %17 = vector.extract_strided_slice %0 {offsets = [0, 2], sizes = [4, 1], strides = [1, 1]} : vector<4x8xf32> to vector<4x1xf32>
    %18 = vector.extract_strided_slice %1 {offsets = [2, 0], sizes = [1, 16], strides = [1, 1]} : vector<3x16xf32> to vector<1x16xf32>
    %19 = vector.broadcast %17 : vector<4x1xf32> to vector<4x16xf32>
    %20 = vector.broadcast %18 : vector<1x16xf32> to vector<4x16xf32>
    %21 = arith.mulf %19, %20 : vector<4x16xf32>
    %22 = arith.addf %16, %21 : vector<4x16xf32>
    %cst_5 = arith.constant 0.000000e+00 : f32
    %23 = vector.broadcast %cst_5 : f32 to vector<4x16xf32>
    %24 = arith.maximumf %22, %23 : vector<4x16xf32>
    %25 = vector.extract_strided_slice %0 {offsets = [0, 1], sizes = [4, 1], strides = [1, 1]} : vector<4x8xf32> to vector<4x1xf32>
    %26 = vector.extract_strided_slice %1 {offsets = [0, 0], sizes = [1, 16], strides = [1, 1]} : vector<3x16xf32> to vector<1x16xf32>
    %27 = vector.broadcast %25 : vector<4x1xf32> to vector<4x16xf32>
    %28 = vector.broadcast %26 : vector<1x16xf32> to vector<4x16xf32>
    %29 = arith.mulf %27, %28 : vector<4x16xf32>
    %30 = vector.broadcast %2 : vector<1x16xf32> to vector<4x16xf32>
    %31 = arith.addf %30, %29 : vector<4x16xf32>
    %32 = vector.extract_strided_slice %0 {offsets = [0, 2], sizes = [4, 1], strides = [1, 1]} : vector<4x8xf32> to vector<4x1xf32>
    %33 = vector.extract_strided_slice %1 {offsets = [1, 0], sizes = [1, 16], strides = [1, 1]} : vector<3x16xf32> to vector<1x16xf32>
    %34 = vector.broadcast %32 : vector<4x1xf32> to vector<4x16xf32>
    %35 = vector.broadcast %33 : vector<1x16xf32> to vector<4x16xf32>
    %36 = arith.mulf %34, %35 : vector<4x16xf32>
    %37 = arith.addf %31, %36 : vector<4x16xf32>
    %38 = vector.extract_strided_slice %0 {offsets = [0, 3], sizes = [4, 1], strides = [1, 1]} : vector<4x8xf32> to vector<4x1xf32>
    %39 = vector.extract_strided_slice %1 {offsets = [2, 0], sizes = [1, 16], strides = [1, 1]} : vector<3x16xf32> to vector<1x16xf32>
    %40 = vector.broadcast %38 : vector<4x1xf32> to vector<4x16xf32>
    %41 = vector.broadcast %39 : vector<1x16xf32> to vector<4x16xf32>
    %42 = arith.mulf %40, %41 : vector<4x16xf32>
    %43 = arith.addf %37, %42 : vector<4x16xf32>
    %cst_6 = arith.constant 0.000000e+00 : f32
    %44 = vector.broadcast %cst_6 : f32 to vector<4x16xf32>
    %45 = arith.maximumf %43, %44 : vector<4x16xf32>
    %46 = vector.extract_strided_slice %0 {offsets = [0, 2], sizes = [4, 1], strides = [1, 1]} : vector<4x8xf32> to vector<4x1xf32>
    %47 = vector.extract_strided_slice %1 {offsets = [0, 0], sizes = [1, 16], strides = [1, 1]} : vector<3x16xf32> to vector<1x16xf32>
    %48 = vector.broadcast %46 : vector<4x1xf32> to vector<4x16xf32>
    %49 = vector.broadcast %47 : vector<1x16xf32> to vector<4x16xf32>
    %50 = arith.mulf %48, %49 : vector<4x16xf32>
    %51 = vector.broadcast %2 : vector<1x16xf32> to vector<4x16xf32>
    %52 = arith.addf %51, %50 : vector<4x16xf32>
    %53 = vector.extract_strided_slice %0 {offsets = [0, 3], sizes = [4, 1], strides = [1, 1]} : vector<4x8xf32> to vector<4x1xf32>
    %54 = vector.extract_strided_slice %1 {offsets = [1, 0], sizes = [1, 16], strides = [1, 1]} : vector<3x16xf32> to vector<1x16xf32>
    %55 = vector.broadcast %53 : vector<4x1xf32> to vector<4x16xf32>
    %56 = vector.broadcast %54 : vector<1x16xf32> to vector<4x16xf32>
    %57 = arith.mulf %55, %56 : vector<4x16xf32>
    %58 = arith.addf %52, %57 : vector<4x16xf32>
    %59 = vector.extract_strided_slice %0 {offsets = [0, 4], sizes = [4, 1], strides = [1, 1]} : vector<4x8xf32> to vector<4x1xf32>
    %60 = vector.extract_strided_slice %1 {offsets = [2, 0], sizes = [1, 16], strides = [1, 1]} : vector<3x16xf32> to vector<1x16xf32>
    %61 = vector.broadcast %59 : vector<4x1xf32> to vector<4x16xf32>
    %62 = vector.broadcast %60 : vector<1x16xf32> to vector<4x16xf32>
    %63 = arith.mulf %61, %62 : vector<4x16xf32>
    %64 = arith.addf %58, %63 : vector<4x16xf32>
    %cst_7 = arith.constant 0.000000e+00 : f32
    %65 = vector.broadcast %cst_7 : f32 to vector<4x16xf32>
    %66 = arith.maximumf %64, %65 : vector<4x16xf32>
    %67 = vector.extract_strided_slice %0 {offsets = [0, 3], sizes = [4, 1], strides = [1, 1]} : vector<4x8xf32> to vector<4x1xf32>
    %68 = vector.extract_strided_slice %1 {offsets = [0, 0], sizes = [1, 16], strides = [1, 1]} : vector<3x16xf32> to vector<1x16xf32>
    %69 = vector.broadcast %67 : vector<4x1xf32> to vector<4x16xf32>
    %70 = vector.broadcast %68 : vector<1x16xf32> to vector<4x16xf32>
    %71 = arith.mulf %69, %70 : vector<4x16xf32>
    %72 = vector.broadcast %2 : vector<1x16xf32> to vector<4x16xf32>
    %73 = arith.addf %72, %71 : vector<4x16xf32>
    %74 = vector.extract_strided_slice %0 {offsets = [0, 4], sizes = [4, 1], strides = [1, 1]} : vector<4x8xf32> to vector<4x1xf32>
    %75 = vector.extract_strided_slice %1 {offsets = [1, 0], sizes = [1, 16], strides = [1, 1]} : vector<3x16xf32> to vector<1x16xf32>
    %76 = vector.broadcast %74 : vector<4x1xf32> to vector<4x16xf32>
    %77 = vector.broadcast %75 : vector<1x16xf32> to vector<4x16xf32>
    %78 = arith.mulf %76, %77 : vector<4x16xf32>
    %79 = arith.addf %73, %78 : vector<4x16xf32>
    %80 = vector.extract_strided_slice %0 {offsets = [0, 5], sizes = [4, 1], strides = [1, 1]} : vector<4x8xf32> to vector<4x1xf32>
    %81 = vector.extract_strided_slice %1 {offsets = [2, 0], sizes = [1, 16], strides = [1, 1]} : vector<3x16xf32> to vector<1x16xf32>
    %82 = vector.broadcast %80 : vector<4x1xf32> to vector<4x16xf32>
    %83 = vector.broadcast %81 : vector<1x16xf32> to vector<4x16xf32>
    %84 = arith.mulf %82, %83 : vector<4x16xf32>
    %85 = arith.addf %79, %84 : vector<4x16xf32>
    %cst_8 = arith.constant 0.000000e+00 : f32
    %86 = vector.broadcast %cst_8 : f32 to vector<4x16xf32>
    %87 = arith.maximumf %85, %86 : vector<4x16xf32>
    %88 = vector.extract_strided_slice %0 {offsets = [0, 4], sizes = [4, 1], strides = [1, 1]} : vector<4x8xf32> to vector<4x1xf32>
    %89 = vector.extract_strided_slice %1 {offsets = [0, 0], sizes = [1, 16], strides = [1, 1]} : vector<3x16xf32> to vector<1x16xf32>
    %90 = vector.broadcast %88 : vector<4x1xf32> to vector<4x16xf32>
    %91 = vector.broadcast %89 : vector<1x16xf32> to vector<4x16xf32>
    %92 = arith.mulf %90, %91 : vector<4x16xf32>
    %93 = vector.broadcast %2 : vector<1x16xf32> to vector<4x16xf32>
    %94 = arith.addf %93, %92 : vector<4x16xf32>
    %95 = vector.extract_strided_slice %0 {offsets = [0, 5], sizes = [4, 1], strides = [1, 1]} : vector<4x8xf32> to vector<4x1xf32>
    %96 = vector.extract_strided_slice %1 {offsets = [1, 0], sizes = [1, 16], strides = [1, 1]} : vector<3x16xf32> to vector<1x16xf32>
    %97 = vector.broadcast %95 : vector<4x1xf32> to vector<4x16xf32>
    %98 = vector.broadcast %96 : vector<1x16xf32> to vector<4x16xf32>
    %99 = arith.mulf %97, %98 : vector<4x16xf32>
    %100 = arith.addf %94, %99 : vector<4x16xf32>
    %101 = vector.extract_strided_slice %0 {offsets = [0, 6], sizes = [4, 1], strides = [1, 1]} : vector<4x8xf32> to vector<4x1xf32>
    %102 = vector.extract_strided_slice %1 {offsets = [2, 0], sizes = [1, 16], strides = [1, 1]} : vector<3x16xf32> to vector<1x16xf32>
    %103 = vector.broadcast %101 : vector<4x1xf32> to vector<4x16xf32>
    %104 = vector.broadcast %102 : vector<1x16xf32> to vector<4x16xf32>
    %105 = arith.mulf %103, %104 : vector<4x16xf32>
    %106 = arith.addf %100, %105 : vector<4x16xf32>
    %cst_9 = arith.constant 0.000000e+00 : f32
    %107 = vector.broadcast %cst_9 : f32 to vector<4x16xf32>
    %108 = arith.maximumf %106, %107 : vector<4x16xf32>
    %109 = vector.extract_strided_slice %0 {offsets = [0, 5], sizes = [4, 1], strides = [1, 1]} : vector<4x8xf32> to vector<4x1xf32>
    %110 = vector.extract_strided_slice %1 {offsets = [0, 0], sizes = [1, 16], strides = [1, 1]} : vector<3x16xf32> to vector<1x16xf32>
    %111 = vector.broadcast %109 : vector<4x1xf32> to vector<4x16xf32>
    %112 = vector.broadcast %110 : vector<1x16xf32> to vector<4x16xf32>
    %113 = arith.mulf %111, %112 : vector<4x16xf32>
    %114 = vector.broadcast %2 : vector<1x16xf32> to vector<4x16xf32>
    %115 = arith.addf %114, %113 : vector<4x16xf32>
    %116 = vector.extract_strided_slice %0 {offsets = [0, 6], sizes = [4, 1], strides = [1, 1]} : vector<4x8xf32> to vector<4x1xf32>
    %117 = vector.extract_strided_slice %1 {offsets = [1, 0], sizes = [1, 16], strides = [1, 1]} : vector<3x16xf32> to vector<1x16xf32>
    %118 = vector.broadcast %116 : vector<4x1xf32> to vector<4x16xf32>
    %119 = vector.broadcast %117 : vector<1x16xf32> to vector<4x16xf32>
    %120 = arith.mulf %118, %119 : vector<4x16xf32>
    %121 = arith.addf %115, %120 : vector<4x16xf32>
    %122 = vector.extract_strided_slice %0 {offsets = [0, 7], sizes = [4, 1], strides = [1, 1]} : vector<4x8xf32> to vector<4x1xf32>
    %123 = vector.extract_strided_slice %1 {offsets = [2, 0], sizes = [1, 16], strides = [1, 1]} : vector<3x16xf32> to vector<1x16xf32>
    %124 = vector.broadcast %122 : vector<4x1xf32> to vector<4x16xf32>
    %125 = vector.broadcast %123 : vector<1x16xf32> to vector<4x16xf32>
    %126 = arith.mulf %124, %125 : vector<4x16xf32>
    %127 = arith.addf %121, %126 : vector<4x16xf32>
    %cst_10 = arith.constant 0.000000e+00 : f32
    %128 = vector.broadcast %cst_10 : f32 to vector<4x16xf32>
    %129 = arith.maximumf %127, %128 : vector<4x16xf32>
    %c0_11 = arith.constant 0 : index
    %c0_12 = arith.constant 0 : index
    %130 = vector.load %arg10[%c0_11, %c0_12] : memref<4x288xf32, #tpu.memory_space<vmem>>, vector<4x16xf32>
    tpu.vector_store %arg10[%c0_11, %c0_12], %3 {strides = array<i32>} : memref<4x288xf32, #tpu.memory_space<vmem>>, vector<4x16xf32>,
    %c0_13 = arith.constant 0 : index
    %c16 = arith.constant 16 : index
    %131 = vector.load %arg10[%c0_13, %c16] : memref<4x288xf32, #tpu.memory_space<vmem>>, vector<4x16xf32>
    tpu.vector_store %arg10[%c0_13, %c16], %24 {strides = array<i32>} : memref<4x288xf32, #tpu.memory_space<vmem>>, vector<4x16xf32>,
    %c0_14 = arith.constant 0 : index
    %c32 = arith.constant 32 : index
    %132 = vector.load %arg10[%c0_14, %c32] : memref<4x288xf32, #tpu.memory_space<vmem>>, vector<4x16xf32>
    tpu.vector_store %arg10[%c0_14, %c32], %45 {strides = array<i32>} : memref<4x288xf32, #tpu.memory_space<vmem>>, vector<4x16xf32>,
    %c0_15 = arith.constant 0 : index
    %c48 = arith.constant 48 : index
    %133 = vector.load %arg10[%c0_15, %c48] : memref<4x288xf32, #tpu.memory_space<vmem>>, vector<4x16xf32>
    tpu.vector_store %arg10[%c0_15, %c48], %24 {strides = array<i32>} : memref<4x288xf32, #tpu.memory_space<vmem>>, vector<4x16xf32>,
    %c0_16 = arith.constant 0 : index
    %c64 = arith.constant 64 : index
    %134 = vector.load %arg10[%c0_16, %c64] : memref<4x288xf32, #tpu.memory_space<vmem>>, vector<4x16xf32>
    tpu.vector_store %arg10[%c0_16, %c64], %45 {strides = array<i32>} : memref<4x288xf32, #tpu.memory_space<vmem>>, vector<4x16xf32>,
    %c0_17 = arith.constant 0 : index
    %c80 = arith.constant 80 : index
    %135 = vector.load %arg10[%c0_17, %c80] : memref<4x288xf32, #tpu.memory_space<vmem>>, vector<4x16xf32>
    tpu.vector_store %arg10[%c0_17, %c80], %66 {strides = array<i32>} : memref<4x288xf32, #tpu.memory_space<vmem>>, vector<4x16xf32>,
    %c0_18 = arith.constant 0 : index
    %c96 = arith.constant 96 : index
    %136 = vector.load %arg10[%c0_18, %c96] : memref<4x288xf32, #tpu.memory_space<vmem>>, vector<4x16xf32>
    tpu.vector_store %arg10[%c0_18, %c96], %45 {strides = array<i32>} : memref<4x288xf32, #tpu.memory_space<vmem>>, vector<4x16xf32>,
    %c0_19 = arith.constant 0 : index
    %c112 = arith.constant 112 : index
    %137 = vector.load %arg10[%c0_19, %c112] : memref<4x288xf32, #tpu.memory_space<vmem>>, vector<4x16xf32>
    tpu.vector_store %arg10[%c0_19, %c112], %66 {strides = array<i32>} : memref<4x288xf32, #tpu.memory_space<vmem>>, vector<4x16xf32>,
    %c0_20 = arith.constant 0 : index
    %c128 = arith.constant 128 : index
    %138 = vector.load %arg10[%c0_20, %c128] : memref<4x288xf32, #tpu.memory_space<vmem>>, vector<4x16xf32>
    tpu.vector_store %arg10[%c0_20, %c128], %87 {strides = array<i32>} : memref<4x288xf32, #tpu.memory_space<vmem>>, vector<4x16xf32>,
    %c0_21 = arith.constant 0 : index
    %c144 = arith.constant 144 : index
    %139 = vector.load %arg10[%c0_21, %c144] : memref<4x288xf32, #tpu.memory_space<vmem>>, vector<4x16xf32>
    tpu.vector_store %arg10[%c0_21, %c144], %66 {strides = array<i32>} : memref<4x288xf32, #tpu.memory_space<vmem>>, vector<4x16xf32>,
    %c0_22 = arith.constant 0 : index
    %c160 = arith.constant 160 : index
    %140 = vector.load %arg10[%c0_22, %c160] : memref<4x288xf32, #tpu.memory_space<vmem>>, vector<4x16xf32>
    tpu.vector_store %arg10[%c0_22, %c160], %87 {strides = array<i32>} : memref<4x288xf32, #tpu.memory_space<vmem>>, vector<4x16xf32>,
    %c0_23 = arith.constant 0 : index
    %c176 = arith.constant 176 : index
    %141 = vector.load %arg10[%c0_23, %c176] : memref<4x288xf32, #tpu.memory_space<vmem>>, vector<4x16xf32>
    tpu.vector_store %arg10[%c0_23, %c176], %108 {strides = array<i32>} : memref<4x288xf32, #tpu.memory_space<vmem>>, vector<4x16xf32>,
    %c0_24 = arith.constant 0 : index
    %c192 = arith.constant 192 : index
    %142 = vector.load %arg10[%c0_24, %c192] : memref<4x288xf32, #tpu.memory_space<vmem>>, vector<4x16xf32>
    tpu.vector_store %arg10[%c0_24, %c192], %87 {strides = array<i32>} : memref<4x288xf32, #tpu.memory_space<vmem>>, vector<4x16xf32>,
    %c0_25 = arith.constant 0 : index
    %c208 = arith.constant 208 : index
    %143 = vector.load %arg10[%c0_25, %c208] : memref<4x288xf32, #tpu.memory_space<vmem>>, vector<4x16xf32>
    tpu.vector_store %arg10[%c0_25, %c208], %108 {strides = array<i32>} : memref<4x288xf32, #tpu.memory_space<vmem>>, vector<4x16xf32>,
    %c0_26 = arith.constant 0 : index
    %c224 = arith.constant 224 : index
    %144 = vector.load %arg10[%c0_26, %c224] : memref<4x288xf32, #tpu.memory_space<vmem>>, vector<4x16xf32>
    tpu.vector_store %arg10[%c0_26, %c224], %129 {strides = array<i32>} : memref<4x288xf32, #tpu.memory_space<vmem>>, vector<4x16xf32>,
    %c0_27 = arith.constant 0 : index
    %c240 = arith.constant 240 : index
    %145 = vector.load %arg10[%c0_27, %c240] : memref<4x288xf32, #tpu.memory_space<vmem>>, vector<4x16xf32>
    tpu.vector_store %arg10[%c0_27, %c240], %108 {strides = array<i32>} : memref<4x288xf32, #tpu.memory_space<vmem>>, vector<4x16xf32>,
    %c0_28 = arith.constant 0 : index
    %c256 = arith.constant 256 : index
    %146 = vector.load %arg10[%c0_28, %c256] : memref<4x288xf32, #tpu.memory_space<vmem>>, vector<4x16xf32>
    tpu.vector_store %arg10[%c0_28, %c256], %129 {strides = array<i32>} : memref<4x288xf32, #tpu.memory_space<vmem>>, vector<4x16xf32>,
    %c0_29 = arith.constant 0 : index
    %c272 = arith.constant 272 : index
    %147 = vector.load %arg10[%c0_29, %c272] : memref<4x288xf32, #tpu.memory_space<vmem>>, vector<4x16xf32>
    tpu.vector_store %arg10[%c0_29, %c272], %3 {strides = array<i32>} : memref<4x288xf32, #tpu.memory_space<vmem>>, vector<4x16xf32>,
    %c0_30 = arith.constant 0 : index
    %c0_31 = arith.constant 0 : index
    %148 = vector.load %arg10[%c0_30, %c0_31] : memref<4x288xf32, #tpu.memory_space<vmem>>, vector<4x288xf32>
    %c0_32 = arith.constant 0 : index
    %c0_33 = arith.constant 0 : index
    %149 = vector.load %arg3[%c0_32, %c0_33] : memref<288x192xf32, #tpu.memory_space<vmem>>, vector<288x192xf32>
    %cst_34 = arith.constant dense<0.000000e+00> : vector<4x192xf32>
    %150 = tpu.matmul %148, %149, %cst_34 {dimension_numbers = #tpu.dot_dimension_numbers<[1], [0], [0], [1], [0, 0, 1, 1], [], []>} : vector<4x288xf32>, vector<288x192xf32>, vector<4x192xf32> -> vector<4x192xf32>
    %c0_35 = arith.constant 0 : index
    %c0_36 = arith.constant 0 : index
    %151 = vector.load %arg4[%c0_35, %c0_36] : memref<1x192xf32, #tpu.memory_space<vmem>>, vector<1x192xf32>
    %152 = vector.broadcast %151 : vector<1x192xf32> to vector<4x192xf32>
    %153 = arith.addf %150, %152 : vector<4x192xf32>
    %cst_37 = arith.constant 0.000000e+00 : f32
    %154 = vector.broadcast %cst_37 : f32 to vector<4x192xf32>
    %155 = arith.maximumf %153, %154 : vector<4x192xf32>
    %c0_38 = arith.constant 0 : index
    %c0_39 = arith.constant 0 : index
    %156 = vector.load %arg5[%c0_38, %c0_39] : memref<192x128xf32, #tpu.memory_space<vmem>>, vector<192x128xf32>
    %cst_40 = arith.constant dense<0.000000e+00> : vector<4x128xf32>
    %157 = tpu.matmul %155, %156, %cst_40 {dimension_numbers = #tpu.dot_dimension_numbers<[1], [0], [0], [1], [0, 0, 1, 1], [], []>} : vector<4x192xf32>, vector<192x128xf32>, vector<4x128xf32> -> vector<4x128xf32>
    %c0_41 = arith.constant 0 : index
    %c0_42 = arith.constant 0 : index
    %158 = vector.load %arg6[%c0_41, %c0_42] : memref<1x128xf32, #tpu.memory_space<vmem>>, vector<1x128xf32>
    %159 = vector.broadcast %158 : vector<1x128xf32> to vector<4x128xf32>
    %160 = arith.addf %157, %159 : vector<4x128xf32>
    %cst_43 = arith.constant 0.000000e+00 : f32
    %161 = vector.broadcast %cst_43 : f32 to vector<4x128xf32>
    %162 = arith.maximumf %160, %161 : vector<4x128xf32>
    %c0_44 = arith.constant 0 : index
    %c0_45 = arith.constant 0 : index
    %163 = vector.load %arg7[%c0_44, %c0_45] : memref<128x1xf32, #tpu.memory_space<vmem>>, vector<128x1xf32>
    %cst_46 = arith.constant dense<0.000000e+00> : vector<4x1xf32>
    %164 = tpu.matmul %162, %163, %cst_46 {dimension_numbers = #tpu.dot_dimension_numbers<[1], [0], [0], [1], [0, 0, 1, 1], [], []>} : vector<4x128xf32>, vector<128x1xf32>, vector<4x1xf32> -> vector<4x1xf32>
    %c0_47 = arith.constant 0 : index
    %c0_48 = arith.constant 0 : index
    %165 = vector.load %arg8[%c0_47, %c0_48] : memref<1x1xf32, #tpu.memory_space<vmem>>, vector<1x1xf32>
    %166 = vector.broadcast %165 : vector<1x1xf32> to vector<4x1xf32>
    %167 = arith.addf %164, %166 : vector<4x1xf32>
    %c0_49 = arith.constant 0 : index
    %c0_50 = arith.constant 0 : index
    %168 = vector.load %arg9[%c0_49, %c0_50] : memref<4x1xf32, #tpu.memory_space<vmem>>, vector<4x1xf32>
    tpu.vector_store %arg9[%c0_49, %c0_50], %167 {strides = array<i32>} : memref<4x1xf32, #tpu.memory_space<vmem>>, vector<4x1xf32>,
    return
  }
}

</mosaic_0001>

<bundles_post_ra>
// kernel: tile.8
= control target key start
LH: loop header
LB: loop body
LE: loop exit
PB: predicated region body
PF: predicated region fallthrough
CT: control target
= control target key end

     0   :  { %s22_s0 = inlined_call_operand.vmem [shape: f32[32], index: 0, kind: input, shape index: {}]   ;;  %s23_s1 = inlined_call_operand.vmem [shape: f32[6,32], index: 1, kind: output, shape index: {}]  }
   0x1   :  { %v4_v0 = vld [vmem:[%s22_s0] ss:$0 sm:$0xff] }
   0x2   :  { %5 = vst [vmem:[%s23_s1] sm:$0xff] %v4_v0 }

// kernel: tile.9
= control target key start
LH: loop header
LB: loop body
LE: loop exit
PB: predicated region body
PF: predicated region fallthrough
CT: control target
= control target key end

     0   :  { %s43_s8 = smov 96   ;;  %s19_s9 = smov 3  ;;  %vm4_vm0 = vcmask 261120   ;;  %vm10_vm1 = vcmask 1048320   ;;  %vm16_vm2 = vcmask 785920   ;;  %vm23_vm3 = vcmask 523520   ;;  %s74_s0 = inlined_call_operand.vmem [shape: f32[6,32], index: 0, kind: input, shape index: {}]   ;;  %s75_s1 = inlined_call_operand.vmem [shape: f32[1,192], index: 1, kind: output, shape index: {}]  }
   0x1   :  { %v36_v0 = vld [vmem:[%s74_s0 + $0x3] sm:$0x1]   ;;  %v37_v1 = vld [vmem:[%s74_s0 + $0x2] sm:$0x1]   ;;  %v38_v2 = vld [vmem:[%s74_s0 + $0x1] ss:$4 sm:%s19_s9]  }
   0x2   :  { %8 = vrot.lane.b32.xlu0 %v36_v0, %s43_s8  ;;  %s2_s14 = smov 3  ;;  %s44_s15 = smov 32  }
   0x3   :  { %21 = vrot.lane.b32.xlu1 %v38_v2, %s44_s15  ;;  %v3_v3 = vld [vmem:[%s74_s0] ss:$4 sm:%s2_s14]   ;;  %s45_s0 = smov 64  }
   0x4   :  { %5 = vst.msk [vmem:[#allocation0] ss:$8 sm:$0x3] %vm4_vm0, %v3_v3  }
   0x6   :  { %14 = vrot.lane.b32.xlu0 %v37_v1, %s45_s0 }
  0x74   :  { %v9_v4 = vpop.permute.xlu0 %8  }
  0x75   :  { %11 = vst.msk [vmem:[#allocation0] sm:$0x1] %vm10_vm1, %v9_v4   ;;  %v22_v5 = vpop.permute.xlu1 %21  }
  0x78   :  { %v15_v6 = vpop.permute.xlu0 %14  }
  0x79   :  { %17 = vst.msk [vmem:[#allocation0] sm:$0x1] %vm16_vm2, %v15_v6  }
  0x7a   :  { %24 = vst.msk [vmem:[#allocation0] ss:$8 sm:$0x3] %vm23_vm3, %v22_v5  }
  0x81   :  { %v28_v7 = vld [vmem:[#allocation0] sm:$0x1]  ;;  %v32_v8 = vld [vmem:[#allocation0 + $0x8] sm:$0x1] }
  0x82   :  { %30 = vst [vmem:[%s75_s1] sm:$0x1] %v28_v7  ;;  %39 = vst [vmem:[%s75_s1 + $0x1] sm:$0x1] %v32_v8 }

// kernel: cnn_forward.1
= control target key start
LH: loop header
LB: loop body
LE: loop exit
PB: predicated region body
PF: predicated region fallthrough
CT: control target
= control target key end

     0   :  { %v867_v0 = vmov 1   ;;  %v868_v1 = vmov 0   ;;  %v869_v3 = vmov 3   ;;  %v870_v4 = vmov 2   ;;  %s876_s25 = smov 16   ;;  %s877_s11 = smov 32   ;;  %s1379_s0 = inlined_call_operand.vmem [shape: f32[4,8], index: 0, kind: input, shape index: {}]   ;;  %s1380_s3 = inlined_call_operand.vmem [shape: f32[288,192], index: 3, kind: input, shape index: {}]   ;;  %s1381_s1 = inlined_call_operand.vmem [shape: f32[3,16], index: 1, kind: input, shape index: {}]   ;;  %s1382_s2 = inlined_call_operand.vmem [shape: f32[1,16], index: 2, kind: input, shape index: {}]   ;;  %s1383_s5 = inlined_call_operand.vmem [shape: f32[192,128], index: 5, kind: input, shape index: {}]   ;;  %s1384_s4 = inlined_call_operand.vmem [shape: f32[1,192], index: 4, kind: input, shape index: {}]   ;;  %s1385_s7 = inlined_call_operand.vmem [shape: f32[128,1], index: 7, kind: input, shape index: {}]   ;;  %s1386_s8 = inlined_call_operand.<no memory space> [shape: f32[1,1], index: 8, kind: input, shape index: {}]   ;;  %s1387_s6 = inlined_call_operand.vmem [shape: f32[1,128], index: 6, kind: input, shape index: {}]   ;;  %s1388_s9 = inlined_call_operand.vmem [shape: f32[4,1], index: 9, kind: output, shape index: {}]  }
   0x1   :  { %859 = vset.pattern.permute.xlu1 %v867_v0  ;;  %857 = vset.pattern.permute.xlu0 %v868_v1  ;;  %v34_v2 = vld [vmem:[%s1379_s0] sm:$0xf]  ;;  %v871_v5 = vmov 4   ;;  %v872_v6 = vmov 5   ;;  %v873_v7 = vmov 6   ;;  %v874_v8 = vmov 7  }
   0x2   :  { %55 = vperm.xlu1 %859, %v34_v2   ;;  %39 = vperm.xlu0 %857, %v34_v2   ;;  %vm130_vm0 = vcmask 125952   ;;  %v207_v9 = vld [vmem:[%s1380_s3 + $0x8] sm:$0xff]  ;;  %v209_v10 = vld [vmem:[%s1380_s3 + $0x18] sm:$0xff]  ;;  %v206_v11 = vld [vmem:[%s1380_s3] sm:$0xff]  ;;  %v875_v12 = vmov 0.0   ;;  %v42_v49 = vlaneseq  ;;  %s878_s20 = smov 48  }
   0x3   :  { %131 = vst.msk [vmem:[#allocation2] sm:$0xf] %vm130_vm0, %v875_v12  ;;  %v703_v13 = vpack.c.bf16 %v209_v10, %v207_v9  ;;  %v208_v14 = vld [vmem:[%s1380_s3 + $0x10] sm:$0xff]  ;;  %v211_v15 = vld [vmem:[%s1380_s3 + $0x28] sm:$0xff]  ;;  %v213_v16 = vld [vmem:[%s1380_s3 + $0x38] sm:$0xff]  ;;  %s879_s28 = smov 64  }
   0x4   :  { %v705_v17 = vpack.c.bf16 %v208_v14, %v206_v11  ;;  %v707_v18 = vpack.c.bf16 %v213_v16, %v211_v15  ;;  %v210_v19 = vld [vmem:[%s1380_s3 + $0x20] sm:$0xff]  ;;  %v212_v20 = vld [vmem:[%s1380_s3 + $0x30] sm:$0xff]  ;;  %v215_v21 = vld [vmem:[%s1380_s3 + $0x48] sm:$0xff]  ;;  %v1018_v50 = vshrl.u32 %v42_v49, 7  ;;  %vm136_vm1 = vcmask 257152   ;;  %s880_s14 = smov 80  }
   0x5   :  { %704 = vmatprep.subr.bf16.mxu0 %v703_v13  ;;  %v217_v22 = vld [vmem:[%s1380_s3 + $0x58] sm:$0xff]  ;;  %v709_v23 = vpack.c.bf16 %v212_v20, %v210_v19  ;;  %v214_v25 = vld [vmem:[%s1380_s3 + $0x40] sm:$0xff]  ;;  %v216_v26 = vld [vmem:[%s1380_s3 + $0x50] sm:$0xff]  ;;  %s881_s26 = smov 96   ;;  %s882_s30 = smov 112   ;;  %vm142_vm2 = vcmask 388352  }
   0x6   :  { %860 = vset.pattern.permute.xlu1 %v869_v3  ;;  %858 = vset.pattern.permute.xlu0 %v870_v4  ;;  %v711_v24 = vpack.c.bf16 %v217_v22, %v215_v21  ;;  %v219_v27 = vld [vmem:[%s1380_s3 + $0x68] sm:$0xff]  ;;  %v221_v28 = vld [vmem:[%s1380_s3 + $0x78] sm:$0xff]  ;;  %v713_v29 = vpack.c.bf16 %v216_v26, %v214_v25  ;;  %v218_v31 = vld [vmem:[%s1380_s3 + $0x60] sm:$0xff]  ;;  %v44_v51 = vsub.s32 0, %v1018_v50  ;;  %v60_v53 = vsub.s32 1, %v1018_v50 }
   0x7   :  { %80 = vperm.xlu1 %860, %v34_v2   ;;  %65 = vperm.xlu0 %858, %v34_v2   ;;  %v715_v30 = vpack.c.bf16 %v221_v28, %v219_v27  ;;  %v220_v32 = vld [vmem:[%s1380_s3 + $0x70] sm:$0xff]  ;;  %v223_v33 = vld [vmem:[%s1380_s3 + $0x88] sm:$0xff]  ;;  %v225_v34 = vld [vmem:[%s1380_s3 + $0x98] sm:$0xff]  ;;  %v70_v55 = vsub.s32 2, %v1018_v50  ;;  %vm147_vm3 = vcmask 519552   ;;  %vm152_vm4 = vcmask 650752  }
   0x8   :  { %706 = vmatpush1.bf16.msra.mxu0 %v705_v17  ;;  %v717_v35 = vpack.c.bf16 %v220_v32, %v218_v31  ;;  %v719_v36 = vpack.c.bf16 %v225_v34, %v223_v33  ;;  %v222_v37 = vld [vmem:[%s1380_s3 + $0x80] sm:$0xff]  ;;  %v224_v38 = vld [vmem:[%s1380_s3 + $0x90] sm:$0xff]  ;;  %v227_v39 = vld [vmem:[%s1380_s3 + $0xa8] sm:$0xff]  ;;  %vm158_vm5 = vcmask 781952   ;;  %vm163_vm6 = vcmask 913152  }
   0x9   :  { %708 = vmatprep.subr.bf16.mxu0 %v707_v18  ;;  %v229_v40 = vld [vmem:[%s1380_s3 + $0xb8] sm:$0xff]  ;;  %v721_v41 = vpack.c.bf16 %v224_v38, %v222_v37  ;;  %v226_v43 = vld [vmem:[%s1380_s3 + $0xa0] sm:$0xff]  ;;  %v228_v44 = vld [vmem:[%s1380_s3 + $0xb0] sm:$0xff]  ;;  %vm168_vm7 = vcmask 1044352   ;;  %vm294_vm8 = vcmask 261120   ;;  %vm472_vm9 = vcmask 523264  }
   0xa   :  { %v723_v42 = vpack.c.bf16 %v229_v40, %v227_v39  ;;  %v231_v45 = vld [vmem:[%s1380_s3 + $0xc8] sm:$0xff]  ;;  %v233_v46 = vld [vmem:[%s1380_s3 + $0xd8] sm:$0xff]  ;;  %v725_v47 = vpack.c.bf16 %v228_v44, %v226_v43  ;;  %v35_v52 = vld [vmem:[%s1381_s1] sm:$0x7]  ;;  %vm884_vm10 = vmmov 0   ;;  %vm640_vm11 = vcmask 3072  }
   0xb   :  { %861 = vset.pattern.permute.xlu1 %v871_v5  ;;  %862 = vset.pattern.permute.xlu0 %v872_v6  ;;  %v727_v48 = vpack.c.bf16 %v233_v46, %v231_v45  ;;  %v1027_v54 = vrot.slane %v35_v52, %v44_v51  ;;  %v1032_v56 = vrot.slane %v35_v52, %v60_v53  ;;  %v230_v57 = vld [vmem:[%s1380_s3 + $0xc0] sm:$0xff]  ;;  %v232_v58 = vld [vmem:[%s1380_s3 + $0xd0] sm:$0xff]  ;;  %v235_v59 = vld [vmem:[%s1380_s3 + $0xe8] sm:$0xff] }
   0xc   :  { %91 = vperm.xlu1 %861, %v34_v2   ;;  %102 = vperm.xlu0 %862, %v34_v2   ;;  %v1046_v60 = vld [vmem:[%s1382_s2] ss:$0 sm:$0xff]  ;;  %v729_v63 = vpack.c.bf16 %v232_v58, %v230_v57  ;;  %v237_v0 = vld [vmem:[%s1380_s3 + $0xf8] sm:$0xff]  ;;  %v1052_v3 = vrot.slane %v35_v52, %v70_v55  ;;  %v239_v14 = vld [vmem:[%s1380_s3 + $0x108] sm:$0xff] }
   0xd   :  { %710 = vmatpush1.bf16.msra.mxu0 %v709_v23  ;;  %v241_v15 = vld [vmem:[%s1380_s3 + $0x118] sm:$0xff]  ;;  %v238_v22 = vld [vmem:[%s1380_s3 + $0x100] sm:$0xff]  ;;  %v240_v23 = vld [vmem:[%s1380_s3 + $0x110] sm:$0xff] }
   0xe   :  { %712 = vmatprep.subr.bf16.mxu0 %v711_v24  ;;  %v735_v21 = vpack.c.bf16 %v241_v15, %v239_v14  ;;  %v737_v25 = vpack.c.bf16 %v240_v23, %v238_v22  ;;  %v247_v52 = vld [vmem:[%s1380_s3 + $0x148] sm:$0xff]  ;;  %v249_v55 = vld [vmem:[%s1380_s3 + $0x158] sm:$0xff]  ;;  %v549_v50 = vld [vmem:[%s1385_s7 + $0x10] sm:$0xff] }
  0x10   :  { %863 = vset.pattern.permute.xlu1 %v873_v7  ;;  %865 = vset.pattern.permute.xlu0 %v874_v8  ;;  %v234_v7 = vld [vmem:[%s1380_s3 + $0xe0] sm:$0xff] }
  0x11   :  { %113 = vperm.xlu1 %863, %v34_v2   ;;  %714 = vmatpush1.bf16.msra.mxu0 %v713_v29  ;;  %v243_v29 = vld [vmem:[%s1380_s3 + $0x128] sm:$0xff] }
  0x12   :  { %716 = vmatprep.subr.bf16.mxu0 %v715_v30  ;;  %v245_v30 = vld [vmem:[%s1380_s3 + $0x138] sm:$0xff] }
  0x15   :  { %864 = vset.pattern.permute.xlu1 %v874_v8  ;;  %718 = vmatpush1.bf16.msra.mxu0 %v717_v35  ;;  %v236_v8 = vld [vmem:[%s1380_s3 + $0xf0] sm:$0xff] }
  0x16   :  { %124 = vperm.xlu1 %864, %v34_v2   ;;  %720 = vmatprep.subr.bf16.mxu0 %v719_v36  ;;  %v731_v2 = vpack.c.bf16 %v237_v0, %v235_v59  ;;  %v733_v9 = vpack.c.bf16 %v236_v8, %v234_v7  ;;  %v739_v36 = vpack.c.bf16 %v245_v30, %v243_v29  ;;  %v251_v8 = vld [vmem:[%s1380_s3 + $0x168] sm:$0xff]  ;;  %v260_v29 = vld [vmem:[%s1380_s3 + $0x1b0] sm:$0xff] }
  0x17   :  { %v743_v59 = vpack.c.bf16 %v249_v55, %v247_v52  ;;  %v444_v55 = vld [vmem:[%s1383_s5 + $0x18] sm:$0xff] }
  0x19   :  { %722 = vmatpush1.bf16.msra.mxu0 %v721_v41  ;;  %v242_v41 = vld [vmem:[%s1380_s3 + $0x120] sm:$0xff] }
  0x1a   :  { %724 = vmatprep.subr.bf16.mxu0 %v723_v42  ;;  %v244_v42 = vld [vmem:[%s1380_s3 + $0x130] sm:$0xff] }
  0x1b   :  { %v741_v49 = vpack.c.bf16 %v244_v42, %v242_v41  ;;  %v268_v41 = vld [vmem:[%s1380_s3 + $0x1f0] sm:$0xff] }
  0x1d   :  { %726 = vmatpush1.bf16.msra.mxu0 %v725_v47 }
  0x1e   :  { %728 = vmatprep.subr.bf16.mxu0 %v727_v48 }
  0x21   :  { %730 = vmatpush1.bf16.msra.mxu0 %v729_v63  ;;  %v248_v63 = vld [vmem:[%s1380_s3 + $0x150] sm:$0xff] }
  0x22   :  { %732 = vmatprep.subr.bf16.mxu0 %v731_v2 }
  0x25   :  { %734 = vmatpush1.bf16.msra.mxu0 %v733_v9  ;;  %v253_v9 = vld [vmem:[%s1380_s3 + $0x178] sm:$0xff] }
  0x26   :  { %736 = vmatprep.subr.bf16.mxu0 %v735_v21  ;;  %v254_v21 = vld [vmem:[%s1380_s3 + $0x180] sm:$0xff] }
  0x29   :  { %738 = vmatpush1.bf16.msra.mxu0 %v737_v25  ;;  %v259_v25 = vld [vmem:[%s1380_s3 + $0x1a8] sm:$0xff] }
  0x2a   :  { %740 = vmatprep.subr.bf16.mxu0 %v739_v36  ;;  %v267_v36 = vld [vmem:[%s1380_s3 + $0x1e8] sm:$0xff] }
  0x2d   :  { %742 = vmatpush1.bf16.msra.mxu0 %v741_v49  ;;  %v443_v49 = vld [vmem:[%s1383_s5 + $0x10] sm:$0xff] }
  0x2e   :  { %744 = vmatprep.subr.bf16.mxu0 %v743_v59  ;;  %v446_v59 = vld [vmem:[%s1383_s5 + $0x28] sm:$0xff] }
  0x81   :  { %v56_v61 = vpop.permute.xlu1 %55  ;;  %v40_v62 = vpop.permute.xlu0 %39 }
  0x82   :  { %v46_v1 = vmul.f32 %v1027_v54, %v40_v62  ;;  %v62_v4 = vmul.f32 %v1032_v56, %v56_v61  ;;  %v75_v5 = vmul.f32 %v56_v61, %v1027_v54 }
  0x84   :  { %v53_v6 = vadd.f32 %v1046_v60, %v46_v1  ;;  %v76_v18 = vadd.f32 %v1046_v60, %v75_v5 }
  0x86   :  { %v63_v10 = vadd.f32 %v62_v4, %v53_v6  ;;  %v81_v11 = vpop.permute.xlu1 %80  ;;  %v66_v13 = vpop.permute.xlu0 %65 }
  0x87   :  { %v97_v16 = vmul.f32 %v81_v11, %v1027_v54  ;;  %v72_v17 = vmul.f32 %v1052_v3, %v66_v13  ;;  %v77_v19 = vmul.f32 %v66_v13, %v1032_v56  ;;  %v86_v20 = vmul.f32 %v66_v13, %v1027_v54 }
  0x88   :  { %v83_v26 = vmul.f32 %v81_v11, %v1052_v3  ;;  %v88_v31 = vmul.f32 %v81_v11, %v1032_v56 }
  0x89   :  { %v73_v24 = vadd.f32 %v72_v17, %v63_v10  ;;  %v78_v27 = vadd.f32 %v77_v19, %v76_v18  ;;  %v87_v28 = vadd.f32 %v1046_v60, %v86_v20  ;;  %v98_v32 = vadd.f32 %v1046_v60, %v97_v16  ;;  %v255_v17 = vld [vmem:[%s1380_s3 + $0x188] sm:$0xff]  ;;  %v257_v18 = vld [vmem:[%s1380_s3 + $0x198] sm:$0xff] }
  0x8a   :  { %v747_v10 = vpack.c.bf16 %v253_v9, %v251_v8  ;;  %v751_v19 = vpack.c.bf16 %v257_v18, %v255_v17  ;;  %v454_v8 = vld [vmem:[%s1383_s5 + $0x68] sm:$0xff] }
  0x8b   :  { %v92_v33 = vpop.permute.xlu1 %91  ;;  %v74_v34 = vmax.f32 %v73_v24, 0.0  ;;  %v103_v35 = vpop.permute.xlu0 %102  ;;  %v84_v44 = vadd.f32 %v83_v26, %v78_v27  ;;  %v89_v45 = vadd.f32 %v88_v31, %v87_v28  ;;  %v261_v26 = vld [vmem:[%s1380_s3 + $0x1b8] sm:$0xff]  ;;  %v258_v27 = vld [vmem:[%s1380_s3 + $0x1a0] sm:$0xff]  ;;  %v263_v31 = vld [vmem:[%s1380_s3 + $0x1c8] sm:$0xff] }
  0x8c   :  { %v94_v37 = vmul.f32 %v92_v33, %v1052_v3  ;;  %v99_v38 = vmul.f32 %v92_v33, %v1032_v56  ;;  %v108_v39 = vmul.f32 %v92_v33, %v1027_v54  ;;  %v105_v40 = vmul.f32 %v103_v35, %v1052_v3  ;;  %v262_v33 = vld [vmem:[%s1380_s3 + $0x1c0] sm:$0xff] }
  0x8d   :  { %133 = vrot.lane.b32.xlu0 %v74_v34, %s876_s25  ;;  %v110_v43 = vmul.f32 %v103_v35, %v1032_v56  ;;  %v119_v48 = vmul.f32 %v103_v35, %v1027_v54  ;;  %v1110_v57 = vmax.f32 %v84_v44, 0.0  ;;  %v246_v54 = vld [vmem:[%s1380_s3 + $0x140] sm:$0xff]  ;;  %v755_v28 = vpack.c.bf16 %v261_v26, %v259_v25  ;;  %v264_v35 = vld [vmem:[%s1380_s3 + $0x1d0] sm:$0xff]  ;;  %v273_v44 = vld [vmem:[%s1380_s3 + $0x218] sm:$0xff] }
  0x8e   :  { %v100_v46 = vadd.f32 %v99_v38, %v98_v32  ;;  %v109_v47 = vadd.f32 %v1046_v60, %v108_v39  ;;  %v95_v58 = vadd.f32 %v94_v37, %v89_v45  ;;  %v745_v4 = vpack.c.bf16 %v248_v63, %v246_v54  ;;  %v265_v32 = vld [vmem:[%s1380_s3 + $0x1d8] sm:$0xff] }
  0x8f   :  { %v120_v5 = vadd.f32 %v1046_v60, %v119_v48  ;;  %v252_v60 = vld [vmem:[%s1380_s3 + $0x170] sm:$0xff]  ;;  %v757_v30 = vpack.c.bf16 %v260_v29, %v258_v27  ;;  %v269_v37 = vld [vmem:[%s1380_s3 + $0x1f8] sm:$0xff]  ;;  %v761_v38 = vpack.c.bf16 %v264_v35, %v262_v33  ;;  %v442_v48 = vld [vmem:[%s1383_s5 + $0x8] sm:$0xff] }
  0x90   :  { %v114_v61 = vpop.permute.xlu1 %113  ;;  %v106_v62 = vadd.f32 %v105_v40, %v100_v46  ;;  %v111_v0 = vadd.f32 %v110_v43, %v109_v47  ;;  %v1120_v2 = vmax.f32 %v95_v58, 0.0  ;;  %746 = vmatpush1.bf16.msra.mxu0 %v745_v4  ;;  %v763_v39 = vpack.c.bf16 %v269_v37, %v267_v36  ;;  %v266_v40 = vld [vmem:[%s1380_s3 + $0x1e0] sm:$0xff]  ;;  %v271_v43 = vld [vmem:[%s1380_s3 + $0x208] sm:$0xff]  ;;  %v448_v54 = vld [vmem:[%s1383_s5 + $0x38] sm:$0xff] }
  0x91   :  { %v116_v1 = vmul.f32 %v114_v61, %v1052_v3  ;;  %139 = vrot.lane.b32.xlu0 %v1110_v57, %s877_s11  ;;  %v121_v6 = vmul.f32 %v114_v61, %v1032_v56  ;;  %v250_v56 = vld [vmem:[%s1380_s3 + $0x160] sm:$0xff]  ;;  %748 = vmatprep.subr.bf16.mxu0 %v747_v10  ;;  %v765_v42 = vpack.c.bf16 %v268_v41, %v266_v40  ;;  %v883_v46 = vmov 0.0|0.0   ;;  %v451_v4 = vld [vmem:[%s1383_s5 + $0x50] sm:$0xff]  ;;  %v275_v33 = vld [vmem:[%s1380_s3 + $0x228] sm:$0xff] }
  0x92   :  { %v107_v7 = vmax.f32 %v106_v62, 0.0  ;;  %171 = vrot.lane.b32.xlu1 %v1120_v2, %s876_s25  ;;  %v749_v14 = vpack.c.bf16 %v252_v60, %v250_v56  ;;  %v767_v45 = vpack.c.bf16 %v273_v44, %v271_v43  ;;  %775 = vmatprep.subr.bf16.mxu1 %v883_v46  ;;  %v441_v47 = vld [vmem:[%s1383_s5] sm:$0xff]  ;;  %v447_v62 = vld [vmem:[%s1383_s5 + $0x30] sm:$0xff]  ;;  %v456_v56 = vld [vmem:[%s1383_s5 + $0x78] sm:$0xff] }
  0x93   :  { %v117_v11 = vadd.f32 %v116_v1, %v111_v0  ;;  %v122_v15 = vadd.f32 %v121_v6, %v120_v5  ;;  %v776_v52 = vpack.c.bf16 %v442_v48, %v441_v47  ;;  %v445_v58 = vld [vmem:[%s1383_s5 + $0x20] sm:$0xff]  ;;  %v785_v63 = vpack.c.bf16 %v448_v54, %v447_v62  ;;  %v450_v1 = vld [vmem:[%s1383_s5 + $0x48] sm:$0xff]  ;;  %v452_v5 = vld [vmem:[%s1383_s5 + $0x58] sm:$0xff] }
  0x94   :  { %170 = vst.msk [vmem:[#allocation2 + $0x4] sm:$0xf] %vm130_vm0, %v107_v7  ;;  %750 = vmatpush1.bf16.msra.mxu0 %v749_v14  ;;  %v782_v61 = vpack.c.bf16 %v446_v59, %v445_v58  ;;  %v449_v0 = vld [vmem:[%s1383_s5 + $0x40] sm:$0xff]  ;;  %v791_v6 = vpack.c.bf16 %v452_v5, %v451_v4  ;;  %v455_v10 = vld [vmem:[%s1383_s5 + $0x70] sm:$0xff]  ;;  %v462_v44 = vld [vmem:[%s1383_s5 + $0xa8] sm:$0xff] }
  0x95   :  { %v125_v13 = vpop.permute.xlu1 %124  ;;  %144 = vrot.lane.b32.xlu0 %v74_v34, %s878_s20  ;;  %v118_v22 = vmax.f32 %v117_v11, 0.0  ;;  %752 = vmatprep.subr.bf16.mxu0 %v751_v19  ;;  %v759_v34 = vpack.c.bf16 %v265_v32, %v263_v31  ;;  %v797_v60 = vpack.c.bf16 %v456_v56, %v455_v10  ;;  %v457_v11 = vld [vmem:[%s1383_s5 + $0x80] sm:$0xff]  ;;  %v272_v32 = vld [vmem:[%s1380_s3 + $0x210] sm:$0xff]  ;;  %v464_v48 = vld [vmem:[%s1383_s5 + $0xb8] sm:$0xff] }
  0x96   :  { %v127_v16 = vmul.f32 %v125_v13, %v1052_v3  ;;  %176 = vrot.lane.b32.xlu1 %v107_v7, %s877_s11  ;;  %v256_v3 = vld [vmem:[%s1380_s3 + $0x190] sm:$0xff]  ;;  %777 = vmatpush1.bf16.msra.mxu1 %v776_v52  ;;  %v458_v13 = vld [vmem:[%s1383_s5 + $0x88] sm:$0xff]  ;;  %v270_v31 = vld [vmem:[%s1380_s3 + $0x200] sm:$0xff] }
  0x97   :  { %v753_v23 = vpack.c.bf16 %v256_v3, %v254_v21  ;;  %778 = vmatprep.subr.bf16.mxu1 %v883_v46  ;;  %v800_v14 = vpack.c.bf16 %v458_v13, %v457_v11  ;;  %v769_v37 = vpack.c.bf16 %v272_v32, %v270_v31  ;;  %v276_v40 = vld [vmem:[%s1380_s3 + $0x230] sm:$0xff]  ;;  %v461_v43 = vld [vmem:[%s1383_s5 + $0xa0] sm:$0xff]  ;;  %v548_v54 = vld [vmem:[%s1385_s7 + $0x8] sm:$0xff] }
  0x98   :  { %v128_v20 = vadd.f32 %v127_v16, %v122_v15  ;;  %v459_v15 = vld [vmem:[%s1383_s5 + $0x90] sm:$0xff]  ;;  %v460_v16 = vld [vmem:[%s1383_s5 + $0x98] sm:$0xff]  ;;  %v278_v52 = vld [vmem:[%s1384_s4] sm:$0x3] }
  0x99   :  { %149 = vrot.lane.b32.xlu0 %v1110_v57, %s879_s28  ;;  %754 = vmatpush1.bf16.msra.mxu0 %v753_v23  ;;  %v803_v17 = vpack.c.bf16 %v460_v16, %v459_v15  ;;  %v463_v47 = vld [vmem:[%s1383_s5 + $0xb0] sm:$0xff]  ;;  %v547_v62 = vld [vmem:[%s1385_s7] sm:$0xff]  ;;  %v552_v5 = vld [vmem:[%s1385_s7 + $0x28] sm:$0xff] }
  0x9a   :  { %v129_v24 = vmax.f32 %v128_v20, 0.0  ;;  %181 = vrot.lane.b32.xlu1 %v118_v22, %s878_s20  ;;  %756 = vmatprep.subr.bf16.mxu0 %v755_v28  ;;  %v551_v4 = vld [vmem:[%s1385_s7 + $0x20] sm:$0xff]  ;;  %v556_v56 = vld [vmem:[%s1385_s7 + $0x48] sm:$0xff]  ;;  %v557_v11 = vld [vmem:[%s1385_s7 + $0x50] sm:$0xff] }
  0x9b   :  { %v555_v10 = vld [vmem:[%s1385_s7 + $0x40] sm:$0xff]  ;;  %v558_v13 = vld [vmem:[%s1385_s7 + $0x58] sm:$0xff]  ;;  %v560_v16 = vld [vmem:[%s1385_s7 + $0x68] sm:$0xff] }
  0x9c   :  { %202 = vst.msk [vmem:[#allocation2 + $0x8] sm:$0xf] %vm130_vm0, %v129_v24  ;;  %v559_v15 = vld [vmem:[%s1385_s7 + $0x60] sm:$0xff] }
  0x9d   :  { %155 = vrot.lane.b32.xlu0 %v1120_v2, %s880_s14  ;;  %203 = vst.msk [vmem:[#allocation2 + $0x8] sm:$0xf] %vm136_vm1, %v875_v12  ;;  %758 = vmatpush1.bf16.msra.mxu0 %v757_v30 }
  0x9e   :  { %185 = vrot.lane.b32.xlu1 %v107_v7, %s879_s28  ;;  %760 = vmatprep.subr.bf16.mxu0 %v759_v34  ;;  %v453_v7 = vld [vmem:[%s1383_s5 + $0x60] sm:$0xff]  ;;  %v277_v34 = vld [vmem:[%s1380_s3 + $0x238] sm:$0xff] }
  0x9f   :  { %v794_v9 = vpack.c.bf16 %v454_v8, %v453_v7  ;;  %v553_v7 = vld [vmem:[%s1385_s7 + $0x30] sm:$0xff]  ;;  %v554_v8 = vld [vmem:[%s1385_s7 + $0x38] sm:$0xff] }
  0xa1   :  { %160 = vrot.lane.b32.xlu0 %v1110_v57, %s881_s26  ;;  %762 = vmatpush1.bf16.msra.mxu0 %v761_v38  ;;  %v779_v57 = vpack.c.bf16 %v444_v55, %v443_v49  ;;  %v771_v38 = vpack.c.bf16 %v277_v34, %v275_v33  ;;  %v809_v49 = vpack.c.bf16 %v464_v48, %v463_v47 }
  0xa2   :  { %189 = vrot.lane.b32.xlu1 %v118_v22, %s880_s14  ;;  %764 = vmatprep.subr.bf16.mxu0 %v763_v39  ;;  %v274_v39 = vld [vmem:[%s1380_s3 + $0x220] sm:$0xff]  ;;  %v283_v55 = vrot.slane %v278_v52, %v44_v51  ;;  %v550_v51 = vld [vmem:[%s1385_s7 + $0x18] sm:$0xff] }
  0xa3   :  { %780 = vmatpush1.bf16.msra.mxu1 %v779_v57  ;;  %v773_v41 = vpack.c.bf16 %v276_v40, %v274_v39  ;;  %v287_v57 = vrot.slane %v278_v52, %v60_v53  ;;  %v815_v53 = vpack.c.bf16 %v550_v51, %v549_v50 }
  0xa4   :  { %781 = vmatprep.subr.bf16.mxu1 %v883_v46 }
  0xa5   :  { %165 = vrot.lane.b32.xlu0 %v1120_v2, %s882_s30  ;;  %766 = vmatpush1.bf16.msra.mxu0 %v765_v42  ;;  %v788_v2 = vpack.c.bf16 %v450_v1, %v449_v0  ;;  %v205_v42 = vld [vmem:[#allocation2 + $0x8] sm:$0xf]  ;;  %v812_v1 = vpack.c.bf16 %v548_v54, %v547_v62 }
  0xa6   :  { %194 = vrot.lane.b32.xlu1 %v129_v24, %s881_s26  ;;  %768 = vmatprep.subr.bf16.mxu0 %v767_v45  ;;  %v806_v45 = vpack.c.bf16 %v462_v44, %v461_v43 }
  0xa7   :  { %783 = vmatpush1.bf16.msra.mxu1 %v782_v61 }
  0xa8   :  { %784 = vmatprep.subr.bf16.mxu1 %v883_v46 }
  0xaa   :  { %198 = vrot.lane.b32.xlu1 %v118_v22, %s882_s30 }
  0xab   :  { %786 = vmatpush1.bf16.msra.mxu1 %v785_v63 }
  0xac   :  { %787 = vmatprep.subr.bf16.mxu1 %v883_v46 }
  0xaf   :  { %789 = vmatpush1.bf16.msra.mxu1 %v788_v2 }
  0xb0   :  { %790 = vmatprep.subr.bf16.mxu1 %v883_v46 }
  0xb3   :  { %792 = vmatpush1.bf16.msra.mxu1 %v791_v6  ;;  %v818_v6 = vpack.c.bf16 %v552_v5, %v551_v4 }
  0xb4   :  { %793 = vmatprep.subr.bf16.mxu1 %v883_v46 }
  0xb7   :  { %795 = vmatpush1.bf16.msra.mxu1 %v794_v9  ;;  %v821_v9 = vpack.c.bf16 %v554_v8, %v553_v7 }
  0xb8   :  { %796 = vmatprep.subr.bf16.mxu1 %v883_v46 }
  0xbb   :  { %798 = vmatpush1.bf16.msra.mxu1 %v797_v60  ;;  %v824_v60 = vpack.c.bf16 %v556_v56, %v555_v10 }
  0xbc   :  { %799 = vmatprep.subr.bf16.mxu1 %v883_v46 }
  0xbf   :  { %801 = vmatpush1.bf16.msra.mxu1 %v800_v14  ;;  %v827_v14 = vpack.c.bf16 %v558_v13, %v557_v11 }
  0xc0   :  { %802 = vmatprep.subr.bf16.mxu1 %v883_v46 }
  0xc3   :  { %804 = vmatpush1.bf16.msra.mxu1 %v803_v17  ;;  %v830_v17 = vpack.c.bf16 %v560_v16, %v559_v15 }
  0xc4   :  { %805 = vmatprep.subr.bf16.mxu1 %v883_v46 }
  0xc7   :  { %807 = vmatpush1.bf16.msra.mxu1 %v806_v45 }
  0xc8   :  { %808 = vmatprep.subr.bf16.mxu1 %v883_v46 }
  0xcb   :  { %810 = vmatpush1.bf16.msra.mxu1 %v809_v49 }
  0xcc   :  { %811 = vmatprep.subr.bf16.mxu1 %v883_v46 }
  0xff   :  { %v134_v18 = vpop.permute.xlu0 %133 }
 0x100   :  { %137 = vst.msk [vmem:[#allocation2] sm:$0xf] %vm136_vm1, %v134_v18  ;;  %v561_v18 = vld [vmem:[%s1385_s7 + $0x70] sm:$0xff] }
 0x103   :  { %v140_v19 = vpop.permute.xlu0 %139 }
 0x104   :  { %143 = vst.msk [vmem:[#allocation2] sm:$0xf] %vm142_vm2, %v140_v19  ;;  %v172_v20 = vpop.permute.xlu1 %171  ;;  %v562_v19 = vld [vmem:[%s1385_s7 + $0x78] sm:$0xff] }
 0x105   :  { %174 = vst.msk [vmem:[#allocation2 + $0x4] sm:$0xf] %vm136_vm1, %v172_v20  ;;  %v833_v20 = vpack.c.bf16 %v562_v19, %v561_v18 }
 0x107   :  { %v145_v21 = vpop.permute.xlu0 %144 }
 0x108   :  { %148 = vst.msk [vmem:[#allocation2] sm:$0xf] %vm147_vm3, %v145_v21  ;;  %v177_v3 = vpop.permute.xlu1 %176  ;;  %v14_v21 = vstv %s1386_s8 }
 0x109   :  { %179 = vst.msk [vmem:[#allocation2 + $0x4] sm:$0xf] %vm142_vm2, %v177_v3  ;;  %15 = vst [vmem:[#allocation3] sm:$0x1] %v14_v21 }
 0x10b   :  { %v150_v22 = vpop.permute.xlu0 %149 }
 0x10c   :  { %153 = vst.msk [vmem:[#allocation2] sm:$0xf] %vm152_vm4, %v150_v22  ;;  %v182_v23 = vpop.permute.xlu1 %181 }
 0x10d   :  { %184 = vst.msk [vmem:[#allocation2 + $0x4] sm:$0xf] %vm147_vm3, %v182_v23 }
 0x10f   :  { %v156_v24 = vpop.permute.xlu0 %155 }
 0x110   :  { %159 = vst.msk [vmem:[#allocation2] sm:$0xf] %vm158_vm5, %v156_v24  ;;  %v186_v25 = vpop.permute.xlu1 %185 }
 0x111   :  { %188 = vst.msk [vmem:[#allocation2 + $0x4] sm:$0xf] %vm152_vm4, %v186_v25  ;;  %v650_v25 = vld [vmem:[#allocation3] ss:$0 sm:$0xff] }
 0x113   :  { %v161_v26 = vpop.permute.xlu0 %160 }
 0x114   :  { %164 = vst.msk [vmem:[#allocation2] sm:$0xf] %vm163_vm6, %v161_v26  ;;  %v190_v27 = vpop.permute.xlu1 %189 }
 0x115   :  { %192 = vst.msk [vmem:[#allocation2 + $0x4] sm:$0xf] %vm158_vm5, %v190_v27 }
 0x117   :  { %v166_v28 = vpop.permute.xlu0 %165 }
 0x118   :  { %169 = vst.msk [vmem:[#allocation2] sm:$0xf] %vm168_vm7, %v166_v28  ;;  %v195_v29 = vpop.permute.xlu1 %194 }
 0x119   :  { %197 = vst.msk [vmem:[#allocation2 + $0x4] sm:$0xf] %vm163_vm6, %v195_v29 }
 0x11c   :  { %v199_v30 = vpop.permute.xlu1 %198 }
 0x11d   :  { %201 = vst.msk [vmem:[#allocation2 + $0x4] sm:$0xf] %vm168_vm7, %v199_v30 }
 0x124   :  { %v204_v35 = vld [vmem:[#allocation2] sm:$0xff] }
 0x125   :  { %v292_v36 = vcombine.high %v204_v35, %v204_v35 }
 0x127   :  { %361 = vmatprep.mubr.f32.mxu0 %v292_v36 }
 0x128   :  { %362 = vmatmul.mubr.f32.vlgmr.msra.gmra.mrb[0].mxu0 %v204_v35 }
 0x129   :  { %770 = vmatpush1.bf16.msra.mxu0 %v769_v37  ;;  %432 = vmatprep.mubr.f32.mxu0 %v875_v12 }
 0x12a   :  { %772 = vmatprep.subr.bf16.mxu0 %v771_v38 }
 0x12d   :  { %774 = vmatpush1.bf16.msra.mxu0 %v773_v41 }
 0x130   :  { %647 = vmatmul.mubr.msk.f32.vlgmr.msra.gmra.mrb[0].mxu0 %vm294_vm8, %v205_v42 }
 0x203   :  { %v434_v58 = vpop.f32.mrb[0].mxu0 }
 0x204   :  { %v835_v59 = vadd.f32 %v434_v58, %v283_v55  ;;  %v436_v61 = vpop.f32.mrb[1].mxu0 }
 0x205   :  { %v836_v63 = vadd.f32 %v436_v61, %v287_v57 }
 0x206   :  { %v439_v2 = vmax.f32 %v835_v59, 0.0 }
 0x207   :  { %v440_v0 = vmax.f32 %v836_v63, 0.0 }
 0x209   :  { %649 = vmatprep.mubr.msk.f32.mxu1 %vm472_vm9, %v440_v0 }
 0x20a   :  { %541 = vmatmul.mubr.f32.vlgmr.msra.gmra.mrb[0].mxu1 %v439_v2 }
 0x20b   :  { %813 = vmatpush3.bf16.msra.mxu1 %v812_v1  ;;  %700 = vmatprep.mubr.msk.f32.mxu1 %vm884_vm10, %v875_v12 }
 0x20c   :  { %814 = vmatprep.subr.bf16.mxu1 %v883_v46 }
 0x20f   :  { %816 = vmatpush3.bf16.msra.mxu1 %v815_v53 }
 0x210   :  { %817 = vmatprep.subr.bf16.mxu1 %v883_v46 }
 0x213   :  { %819 = vmatpush3.bf16.msra.mxu1 %v818_v6 }
 0x214   :  { %820 = vmatprep.subr.bf16.mxu1 %v883_v46 }
 0x217   :  { %822 = vmatpush3.bf16.msra.mxu1 %v821_v9 }
 0x218   :  { %823 = vmatprep.subr.bf16.mxu1 %v883_v46 }
 0x21b   :  { %825 = vmatpush3.bf16.msra.mxu1 %v824_v60 }
 0x21c   :  { %826 = vmatprep.subr.bf16.mxu1 %v883_v46 }
 0x21f   :  { %828 = vmatpush3.bf16.msra.mxu1 %v827_v14 }
 0x220   :  { %829 = vmatprep.subr.bf16.mxu1 %v883_v46 }
 0x223   :  { %831 = vmatpush3.bf16.msra.mxu1 %v830_v17 }
 0x224   :  { %832 = vmatprep.subr.bf16.mxu1 %v883_v46  ;;  %v648_v46 = vld [vmem:[%s1387_s6] ss:$0 sm:$0xff] }
 0x227   :  { %834 = vmatpush3.bf16.msra.mxu1 %v833_v20 }
 0x2dd   :  { %v542_v3 = vpop.f32.mrb[0].mxu1 }
 0x2de   :  { %v543_v22 = vadd.f32 %v648_v46, %v542_v3  ;;  %v544_v23 = vpop.f32.mrb[1].mxu1 }
 0x2e0   :  { %v546_v24 = vmax.f32 %v543_v22, 0.0 }
 0x2e2   :  { %701 = vmatmul.mubr.f32.vlgmr.msra.gmra.mrb[2].mxu1 %v546_v24 }
 0x3b5   :  { %v636_v26 = vpop.f32.mrb[2].mxu1 }
 0x3b6   :  { %v637_v27 = vadd.f32 %v650_v25, %v636_v26  ;;  %v702_v28 = vpop.f32.mrb[3].mxu1 }
 0x3b8   :  { %641 = vst.msk [vmem:[%s1388_s9] sm:$0xf] %vm640_vm11, %v637_v27 }

</bundles_post_ra>
